<compile_context>
chip_gen: v6e
topology: v6e:2x2x1
jax: 0.10.0
libtpu: 0.0.40
codegen_flags: <defaults>
</compile_context>

<pallas_src>
from typing import NamedTuple

import jax
import jax.numpy as jnp
from jax.experimental import pallas as pl
from jax.experimental.pallas import tpu as pltpu

_LANE = 128      # vreg lane width
_SUBLANE = 8     # vreg sublane count


def _round_up(x, m):
    return (x + m - 1) // m * m


# --------------------------------------------------------------------------- kernels
def _mlp_fused_kernel(x_ref, w1_ref, b1_ref, w2_ref, b2_ref, o_ref):
    """One batch tile: sigmoid(relu(x @ w1 + b1) @ w2 + b2); weights resident."""
    x = x_ref[...].astype(jnp.bfloat16)          # VPU cast; avoids a wrapper pad/cast pass
    h = jnp.dot(x, w1_ref[...], preferred_element_type=jnp.float32)
    h = jnp.maximum(h + b1_ref[...], 0.0)        # bias + ReLU in f32
    y = jnp.dot(h.astype(jnp.bfloat16), w2_ref[...],
                preferred_element_type=jnp.float32)
    y = y + b2_ref[...]
    o_ref[...] = jax.nn.sigmoid(y).astype(o_ref.dtype)


def _mlp_hidden_tiled_kernel(x_ref, w1_ref, b1_ref, w2_ref, b2_ref, o_ref, acc_ref):
    """Fallback when the weights don't fit resident in VMEM: hidden dim tiled on
    grid axis 1, f32 accumulator scratch, finalize (bias2 + sigmoid) on last step."""
    k = pl.program_id(1)

    @pl.when(k == 0)
    def _():
        acc_ref[...] = jnp.zeros_like(acc_ref)

    x = x_ref[...].astype(jnp.bfloat16)
    h = jnp.dot(x, w1_ref[...], preferred_element_type=jnp.float32)
    h = jnp.maximum(h + b1_ref[...], 0.0)
    acc_ref[...] += jnp.dot(h.astype(jnp.bfloat16), w2_ref[...],
                            preferred_element_type=jnp.float32)

    @pl.when(k == pl.num_programs(1) - 1)
    def _():
        y = acc_ref[...] + b2_ref[...]
        o_ref[...] = jax.nn.sigmoid(y).astype(o_ref.dtype)


# --------------------------------------------------------------------------- params
class MLPParams(NamedTuple):
    w1p: jax.Array   # [in_p, h_p]   bf16, zero padded to multiples of 128
    b1p: jax.Array   # [1, h_p]      f32
    w2p: jax.Array   # [h_p, out_p]  bf16
    b2p: jax.Array   # [1, out_p]    f32
    in_size: int
    hidden_size: int
    out_size: int


def prepare_params(w1, b1, w2, b2):
    """One-time lane-dense padding (multiples of 128) + bf16 cast of the weights.

    Do this at init / checkpoint-load time; per-call forwards then never re-read
    and re-write the weight matrices in HBM just to pad/cast them.
    Padding is mathematically inert: padded w1 columns + zero bias -> ReLU(0)=0,
    padded w2 rows are zero, padded output columns are sliced off in the wrapper.
    """
    in_size, hidden = w1.shape
    out_size = w2.shape[1]
    in_p, h_p, out_p = (_round_up(d, _LANE) for d in (in_size, hidden, out_size))
    w1p = jnp.zeros((in_p, h_p), jnp.bfloat16).at[:in_size, :hidden].set(
        w1.astype(jnp.bfloat16))
    w2p = jnp.zeros((h_p, out_p), jnp.bfloat16).at[:hidden, :out_size].set(
        w2.astype(jnp.bfloat16))
    b1p = jnp.zeros((1, h_p), jnp.float32).at[0, :hidden].set(
        b1.reshape(-1).astype(jnp.float32))
    b2p = jnp.zeros((1, out_p), jnp.float32).at[0, :out_size].set(
        b2.reshape(-1).astype(jnp.float32))
    return MLPParams(w1p, b1p, w2p, b2p, in_size, hidden, out_size)


# --------------------------------------------------------------------------- sizing
def _vmem_budget_bytes():
    """Generation-aware VMEM budget (per TensorCore), with headroom."""
    cap = 64 * 1024 * 1024                      # conservative default (v7x per-TC)
    try:
        cap = int(getattr(pltpu.get_tpu_info(), "vmem_capacity_bytes", cap))
    except Exception:
        pass
    return max(cap - 16 * 1024 * 1024, (cap * 3) // 4)


def _fused_vmem_bytes(tb, in_p, h_p, out_p, x_bytes, out_bytes):
    io = 2 * (tb * in_p * x_bytes + tb * out_p * out_bytes)          # double-buffered x / out
    weights = in_p * h_p * 2 + h_p * out_p * 2 + (h_p + out_p) * 4   # resident, single-buffered
    interm = tb * h_p * 4 + tb * out_p * 4                           # f32 h / y temporaries
    return int(1.25 * (io + weights + interm))


def _tiled_vmem_bytes(tb, th, in_p, out_p, x_bytes, out_bytes):
    io = 2 * (tb * in_p * x_bytes + tb * out_p * out_bytes)
    weights = 2 * (in_p * th * 2 + th * out_p * 2 + th * 4) + out_p * 4
    interm = tb * th * 4 + 2 * tb * out_p * 4                        # h tile + acc scratch
    return int(1.25 * (io + weights + interm))


# --------------------------------------------------------------------------- call builders
def _mlp_fused_call(xp, params, *, tb, out_dtype, vmem_limit, single_buffer_weights):
    B = xp.shape[0]
    in_p, h_p = params.w1p.shape
    out_p = params.w2p.shape[1]
    resident = pl.Buffered(buffer_count=1) if single_buffer_weights else None

    flops = 2 * B * (in_p * h_p + h_p * out_p)
    bytes_accessed = (xp.size * xp.dtype.itemsize
                      + params.w1p.size * 2 + params.w2p.size * 2
                      + params.b1p.size * 4 + params.b2p.size * 4
                      + B * out_p * jnp.dtype(out_dtype).itemsize)

    return pl.pallas_call(
        _mlp_fused_kernel,
        out_shape=jax.ShapeDtypeStruct((B, out_p), out_dtype),
        grid=(pl.cdiv(B, tb),),                                     # ragged last block is masked
        in_specs=[
            pl.BlockSpec((tb, in_p), lambda i: (i, 0)),             # x: tiled over batch
            pl.BlockSpec((in_p, h_p), lambda i: (0, 0), pipeline_mode=resident),   # w1 resident
            pl.BlockSpec((1, h_p), lambda i: (0, 0), pipeline_mode=resident),      # b1 resident
            pl.BlockSpec((h_p, out_p), lambda i: (0, 0), pipeline_mode=resident),  # w2 resident
            pl.BlockSpec((1, out_p), lambda i: (0, 0), pipeline_mode=resident),    # b2 resident
        ],
        out_specs=pl.BlockSpec((tb, out_p), lambda i: (i, 0)),      # lane-dense output block
        compiler_params=pltpu.CompilerParams(
            dimension_semantics=("parallel",),                      # megacore over batch tiles
            vmem_limit_bytes=int(vmem_limit),
        ),
        cost_estimate=pl.CostEstimate(
            flops=flops, transcendentals=B * out_p, bytes_accessed=bytes_accessed),
    )(xp, params.w1p, params.b1p, params.w2p, params.b2p)


def _mlp_hidden_tiled_call(xp, params, *, tb, th, out_dtype, vmem_limit):
    B = xp.shape[0]
    in_p, h_p = params.w1p.shape
    out_p = params.w2p.shape[1]

    flops = 2 * B * (in_p * h_p + h_p * out_p)
    bytes_accessed = (xp.size * xp.dtype.itemsize
                      + params.w1p.size * 2 + params.w2p.size * 2
                      + params.b1p.size * 4 + params.b2p.size * 4
                      + B * out_p * jnp.dtype(out_dtype).itemsize)

    return pl.pallas_call(
        _mlp_hidden_tiled_kernel,
        out_shape=jax.ShapeDtypeStruct((B, out_p), out_dtype),
        grid=(pl.cdiv(B, tb), h_p // th),
        in_specs=[
            pl.BlockSpec((tb, in_p), lambda i, k: (i, 0)),   # x: resident across hidden steps
            pl.BlockSpec((in_p, th), lambda i, k: (0, k)),   # w1 column tile
            pl.BlockSpec((1, th), lambda i, k: (0, k)),      # b1 tile
            pl.BlockSpec((th, out_p), lambda i, k: (k, 0)),  # w2 row tile
            pl.BlockSpec((1, out_p), lambda i, k: (0, 0)),   # b2 resident
        ],
        out_specs=pl.BlockSpec((tb, out_p), lambda i, k: (i, 0)),
        scratch_shapes=[pltpu.VMEM((tb, out_p), jnp.float32)],
        compiler_params=pltpu.CompilerParams(
            dimension_semantics=("parallel", "arbitrary"),
            vmem_limit_bytes=int(vmem_limit),
        ),
        cost_estimate=pl.CostEstimate(
            flops=flops, transcendentals=B * out_p, bytes_accessed=bytes_accessed),
    )(xp, params.w1p, params.b1p, params.w2p, params.b2p)


# --------------------------------------------------------------------------- forward
def _mlp_jnp(x, params, out_dtype):
    """Plain-XLA path (tiny problems / extreme-size fallback); same bf16/f32 math."""
    xb = x.astype(jnp.bfloat16)
    h = jnp.maximum(
        jnp.dot(xb, params.w1p[: params.in_size],
                preferred_element_type=jnp.float32) + params.b1p[0], 0.0)
    y = jnp.dot(h.astype(jnp.bfloat16), params.w2p,
                preferred_element_type=jnp.float32) + params.b2p[0]
    return jax.nn.sigmoid(y)[:, : params.out_size].astype(out_dtype)


def mlp_forward(x, params, *, block_batch=None, hidden_block=None,
                out_dtype=jnp.float32, use_pallas=None):
    """Equivalent to PyTorch MLPNet.forward: sigmoid(relu(x @ w1 + b1) @ w2 + b2).

    x:       [B, in_size] float array.
    params:  MLPParams from prepare_params() (padded bf16 weights, f32 biases).
    out_dtype: jnp.float32 (default, dtype parity) or jnp.bfloat16 (halves writeback).
    """
    if x.ndim != 2:
        raise ValueError("mlp_forward expects a 2-D [batch, in_size] input")
    B, in_size = x.shape
    if in_size != params.in_size:
        raise ValueError("input feature size does not match params")
    out_size = params.out_size
    in_p, h_p = params.w1p.shape
    out_p = params.w2p.shape[1]

    # Small-problem bypass: fixed pallas_call overhead dwarfs ~zero FLOPs of work.
    if use_pallas is None:
        use_pallas = B * max(in_p, h_p, out_p) >= (1 << 16)
    if not use_pallas:
        return _mlp_jnp(x, params, out_dtype)

    # x: avoid an extra pad/cast XLA pass when the feature dim is lane-aligned.
    if in_size == in_p:
        xp = x                                           # kernel casts to bf16 on the VPU
    else:
        xp = jnp.zeros((B, in_p), jnp.bfloat16).at[:, :in_size].set(
            x.astype(jnp.bfloat16))                      # single fused pad+cast pass
    x_bytes = jnp.dtype(xp.dtype).itemsize
    out_bytes = jnp.dtype(out_dtype).itemsize

    budget = _vmem_budget_bytes()
    b_aligned = _round_up(B, _SUBLANE)
    tb_cap = 512 if budget <= 56 * 1024 * 1024 else 1024    # moderate batch tiles on v7x
    if block_batch is not None:
        cands = [min(_round_up(block_batch, _SUBLANE), b_aligned)]
    else:
        cands = [min(c, b_aligned) for c in (1024, 512, 256, 128, 64, 32, 16, 8)
                 if c <= tb_cap]
        cands = list(dict.fromkeys(cands))                  # dedupe, keep large-first order

    # Prefer the fused all-resident-weights kernel when it fits the VMEM budget.
    tb = None
    th = None
    if hidden_block is None:
        for c in cands:
            if _fused_vmem_bytes(c, in_p, h_p, out_p, x_bytes, out_bytes) <= budget:
                tb = c
                break

    if tb is None:
        # Weights do not fit resident (or hidden tiling was forced): tile hidden dim.
        if hidden_block is not None:
            th = int(hidden_block)
            if th % _LANE or h_p % th:
                raise ValueError("hidden_block must be a multiple of 128 that divides "
                                 f"the padded hidden dim {h_p}")
        else:
            for t in (2048, 1024, 512, 256, 128):
                if h_p % t == 0 and _tiled_vmem_bytes(
                        _SUBLANE, t, in_p, out_p, x_bytes, out_bytes) <= budget:
                    th = t
                    break
        if th is None:
            # TODO(synk): also tile the in/out feature dims for layers whose single
            # 128-wide hidden slice still overflows VMEM; fall back to XLA for now.
            return _mlp_jnp(x, params, out_dtype)
        for c in cands:
            if _tiled_vmem_bytes(c, th, in_p, out_p, x_bytes, out_bytes) <= budget:
                tb = c
                break
        tb = tb if tb is not None else cands[-1]

    if th is None:
        try:
            out_padded = _mlp_fused_call(xp, params, tb=tb, out_dtype=out_dtype,
                                         vmem_limit=budget, single_buffer_weights=True)
        except Exception:
            # pipeline_mode=pl.Buffered(1) not supported by this jax/Mosaic build;
            # fall back to default (double-buffered) resident weights.
            out_padded = _mlp_fused_call(xp, params, tb=tb, out_dtype=out_dtype,
                                         vmem_limit=budget, single_buffer_weights=False)
    else:
        out_padded = _mlp_hidden_tiled_call(xp, params, tb=tb, th=th,
                                            out_dtype=out_dtype, vmem_limit=budget)

    return out_padded[:, :out_size]      # drop feature padding (batch is never row-padded)


# --------------------------------------------------------------------------- init
def init_params(key, in_size, hidden_size, out_size):
    """nn.Linear-style init: U(-1/sqrt(fan_in), 1/sqrt(fan_in)).  Weights stored
    as [in, out] (transposed vs PyTorch's [out, in]); math identical to x @ W.T + b."""
    k1, k2, k3, k4 = jax.random.split(key, 4)
    bound1 = 1.0 / jnp.sqrt(in_size)
    bound2 = 1.0 / jnp.sqrt(hidden_size)
    w1 = jax.random.uniform(k1, (in_size, hidden_size), jnp.float32, -bound1, bound1)
    b1 = jax.random.uniform(k2, (hidden_size,), jnp.float32, -bound1, bound1)
    w2 = jax.random.uniform(k3, (hidden_size, out_size), jnp.float32, -bound2, bound2)
    b2 = jax.random.uniform(k4, (out_size,), jnp.float32, -bound2, bound2)
    return w1, b1, w2, b2


if __name__ == "__main__":
    key = jax.random.PRNGKey(0)
    kx, kp, kx2, kp2 = jax.random.split(key, 4)

    # --- small demo shapes (as the PyTorch module would typically be used) ----
    in_size, hidden_size, out_size = 16, 32, 8
    batch = 8
    x = jax.random.normal(kx, (batch, in_size), jnp.float32)
    w1, b1, w2, b2 = init_params(kp, in_size, hidden_size, out_size)
    params = prepare_params(w1, b1, w2, b2)     # one-time pad + bf16 cast

    out = jax.block_until_ready(mlp_forward(x, params, use_pallas=True))
    ref = jax.nn.sigmoid(jnp.maximum(x @ w1 + b1, 0.0) @ w2 + b2)
    assert out.shape == (batch, out_size)
    assert jnp.allclose(out, ref, atol=2e-2, rtol=2e-2), \
        f"small case: max abs err {jnp.max(jnp.abs(out - ref))}"

    # --- larger case: ragged last batch block, lane-aligned x (no wrapper pad),
    #     bf16 output option, and the hidden-dim-tiled fallback path -----------
    B2, in2, hid2, out2 = 300, 256, 512, 128
    x2 = jax.random.normal(kx2, (B2, in2), jnp.float32)
    w1b, b1b, w2b, b2b = init_params(kp2, in2, hid2, out2)
    params2 = prepare_params(w1b, b1b, w2b, b2b)

    out_a = jax.block_until_ready(
        mlp_forward(x2, params2, block_batch=256, out_dtype=jnp.bfloat16))
    out_b = jax.block_until_ready(
        mlp_forward(x2, params2, block_batch=256, hidden_block=256))   # forced tiled path
    ref2 = jax.nn.sigmoid(jnp.maximum(x2 @ w1b + b1b, 0.0) @ w2b + b2b)
    assert out_a.shape == (B2, out2) and out_b.shape == (B2, out2)
    assert jnp.allclose(out_a.astype(jnp.float32), ref2, atol=2e-2, rtol=2e-2), \
        f"large/fused: max abs err {jnp.max(jnp.abs(out_a.astype(jnp.float32) - ref2))}"
    assert jnp.allclose(out_b, ref2, atol=2e-2, rtol=2e-2), \
        f"large/tiled: max abs err {jnp.max(jnp.abs(out_b - ref2))}"

    print("KERNEL_OK")
</pallas_src>

<mosaic_0001>
module attributes {stable_mosaic.version = 11 : i64} {
  func.func @_mlp_fused_kernel(%arg0: i32, %arg1: memref<8x128xbf16, #tpu.memory_space<vmem>>, %arg2: memref<128x128xbf16, #tpu.memory_space<vmem>>, %arg3: memref<1x128xf32, #tpu.memory_space<vmem>>, %arg4: memref<128x128xbf16, #tpu.memory_space<vmem>>, %arg5: memref<1x128xf32, #tpu.memory_space<vmem>>, %arg6: memref<8x128xf32, #tpu.memory_space<vmem>>) attributes {dimension_semantics = [#tpu.dimension_semantics<parallel>], iteration_bounds = array<i64: 1>, scalar_prefetch = 0 : i64, scratch_operands = 0 : i64, tpu.core_type = #tpu.core_type<tc>, window_params = [{transform_indices = @transform_0, window_bounds = array<i64: 8, 128>}, {pipeline_mode = #tpu.pipeline_mode<synchronous>, transform_indices = @transform_1, window_bounds = array<i64: 128, 128>}, {pipeline_mode = #tpu.pipeline_mode<synchronous>, transform_indices = @transform_2, window_bounds = array<i64: 1, 128>}, {pipeline_mode = #tpu.pipeline_mode<synchronous>, transform_indices = @transform_3, window_bounds = array<i64: 128, 128>}, {pipeline_mode = #tpu.pipeline_mode<synchronous>, transform_indices = @transform_4, window_bounds = array<i64: 1, 128>}, {transform_indices = @transform_5, window_bounds = array<i64: 8, 128>}]} {
    %c0 = arith.constant 0 : index
    %c0_0 = arith.constant 0 : index
    %0 = vector.load %arg1[%c0, %c0_0] : memref<8x128xbf16, #tpu.memory_space<vmem>>, vector<8x128xbf16>
    %c0_1 = arith.constant 0 : index
    %c0_2 = arith.constant 0 : index
    %1 = vector.load %arg2[%c0_1, %c0_2] : memref<128x128xbf16, #tpu.memory_space<vmem>>, vector<128x128xbf16>
    %cst = arith.constant dense<0.000000e+00> : vector<8x128xf32>
    %2 = tpu.matmul %0, %1, %cst {dimension_numbers = #tpu.dot_dimension_numbers<[1], [0], [0], [1], [0, 0, 1, 1], [], []>} : vector<8x128xbf16>, vector<128x128xbf16>, vector<8x128xf32> -> vector<8x128xf32>
    %c0_3 = arith.constant 0 : index
    %c0_4 = arith.constant 0 : index
    %3 = vector.load %arg3[%c0_3, %c0_4] : memref<1x128xf32, #tpu.memory_space<vmem>>, vector<1x128xf32>
    %4 = vector.broadcast %3 : vector<1x128xf32> to vector<8x128xf32>
    %5 = arith.addf %2, %4 : vector<8x128xf32>
    %cst_5 = arith.constant 0.000000e+00 : f32
    %6 = vector.broadcast %cst_5 : f32 to vector<8x128xf32>
    %7 = arith.maximumf %5, %6 : vector<8x128xf32>
    %8 = arith.truncf %7 : vector<8x128xf32> to vector<8x128xbf16>
    %c0_6 = arith.constant 0 : index
    %c0_7 = arith.constant 0 : index
    %9 = vector.load %arg4[%c0_6, %c0_7] : memref<128x128xbf16, #tpu.memory_space<vmem>>, vector<128x128xbf16>
    %cst_8 = arith.constant dense<0.000000e+00> : vector<8x128xf32>
    %10 = tpu.matmul %8, %9, %cst_8 {dimension_numbers = #tpu.dot_dimension_numbers<[1], [0], [0], [1], [0, 0, 1, 1], [], []>} : vector<8x128xbf16>, vector<128x128xbf16>, vector<8x128xf32> -> vector<8x128xf32>
    %c0_9 = arith.constant 0 : index
    %c0_10 = arith.constant 0 : index
    %11 = vector.load %arg5[%c0_9, %c0_10] : memref<1x128xf32, #tpu.memory_space<vmem>>, vector<1x128xf32>
    %12 = vector.broadcast %11 : vector<1x128xf32> to vector<8x128xf32>
    %13 = arith.addf %10, %12 : vector<8x128xf32>
    %14 = arith.negf %13 : vector<8x128xf32>
    %15 = math.exp %14 : vector<8x128xf32>
    %cst_11 = arith.constant 1.000000e+00 : f32
    %16 = vector.broadcast %cst_11 : f32 to vector<8x128xf32>
    %17 = arith.addf %16, %15 : vector<8x128xf32>
    %18 = arith.divf %16, %17 : vector<8x128xf32>
    %c0_12 = arith.constant 0 : index
    %c0_13 = arith.constant 0 : index
    %19 = vector.load %arg6[%c0_12, %c0_13] : memref<8x128xf32, #tpu.memory_space<vmem>>, vector<8x128xf32>
    tpu.vector_store %arg6[%c0_12, %c0_13], %18 {strides = array<i32>} : memref<8x128xf32, #tpu.memory_space<vmem>>, vector<8x128xf32>,
    return
  }
  func.func @transform_0(%arg0: i32) -> (i32, i32) {
    %c0_i32 = arith.constant 0 : i32
    %c0_i32_0 = arith.constant 0 : i32
    return %arg0, %c0_i32 : i32, i32
  }
  func.func @transform_1(%arg0: i32) -> (i32, i32) {
    %c0_i32 = arith.constant 0 : i32
    %c0_i32_0 = arith.constant 0 : i32
    %c0_i32_1 = arith.constant 0 : i32
    return %c0_i32, %c0_i32_0 : i32, i32
  }
  func.func @transform_2(%arg0: i32) -> (i32, i32) {
    %c0_i32 = arith.constant 0 : i32
    %c0_i32_0 = arith.constant 0 : i32
    %c0_i32_1 = arith.constant 0 : i32
    return %c0_i32, %c0_i32_0 : i32, i32
  }
  func.func @transform_3(%arg0: i32) -> (i32, i32) {
    %c0_i32 = arith.constant 0 : i32
    %c0_i32_0 = arith.constant 0 : i32
    %c0_i32_1 = arith.constant 0 : i32
    return %c0_i32, %c0_i32_0 : i32, i32
  }
  func.func @transform_4(%arg0: i32) -> (i32, i32) {
    %c0_i32 = arith.constant 0 : i32
    %c0_i32_0 = arith.constant 0 : i32
    %c0_i32_1 = arith.constant 0 : i32
    return %c0_i32, %c0_i32_0 : i32, i32
  }
  func.func @transform_5(%arg0: i32) -> (i32, i32) {
    %c0_i32 = arith.constant 0 : i32
    %c0_i32_0 = arith.constant 0 : i32
    return %arg0, %c0_i32 : i32, i32
  }
}

module attributes {stable_mosaic.version = 11 : i64} {
  func.func @_mlp_fused_kernel(%arg0: i32, %arg1: memref<8x128xbf16, #tpu.memory_space<vmem>>, %arg2: memref<128x128xbf16, #tpu.memory_space<vmem>>, %arg3: memref<1x128xf32, #tpu.memory_space<vmem>>, %arg4: memref<128x128xbf16, #tpu.memory_space<vmem>>, %arg5: memref<1x128xf32, #tpu.memory_space<vmem>>, %arg6: memref<8x128xf32, #tpu.memory_space<vmem>>) attributes {dimension_semantics = [#tpu.dimension_semantics<parallel>], iteration_bounds = array<i64: 1>, scalar_prefetch = 0 : i64, scratch_operands = 0 : i64, tpu.core_type = #tpu.core_type<tc>, window_params = [{transform_indices = @transform_0, window_bounds = array<i64: 8, 128>}, {pipeline_mode = #tpu.pipeline_mode<synchronous>, transform_indices = @transform_1, window_bounds = array<i64: 128, 128>}, {pipeline_mode = #tpu.pipeline_mode<synchronous>, transform_indices = @transform_2, window_bounds = array<i64: 1, 128>}, {pipeline_mode = #tpu.pipeline_mode<synchronous>, transform_indices = @transform_3, window_bounds = array<i64: 128, 128>}, {pipeline_mode = #tpu.pipeline_mode<synchronous>, transform_indices = @transform_4, window_bounds = array<i64: 1, 128>}, {transform_indices = @transform_5, window_bounds = array<i64: 8, 128>}]} {
    %c0 = arith.constant 0 : index
    %c0_0 = arith.constant 0 : index
    %0 = vector.load %arg1[%c0, %c0_0] : memref<8x128xbf16, #tpu.memory_space<vmem>>, vector<8x128xbf16>
    %c0_1 = arith.constant 0 : index
    %c0_2 = arith.constant 0 : index
    %1 = vector.load %arg2[%c0_1, %c0_2] : memref<128x128xbf16, #tpu.memory_space<vmem>>, vector<128x128xbf16>
    %cst = arith.constant dense<0.000000e+00> : vector<8x128xf32>
    %2 = tpu.matmul %0, %1, %cst {dimension_numbers = #tpu.dot_dimension_numbers<[1], [0], [0], [1], [0, 0, 1, 1], [], []>} : vector<8x128xbf16>, vector<128x128xbf16>, vector<8x128xf32> -> vector<8x128xf32>
    %c0_3 = arith.constant 0 : index
    %c0_4 = arith.constant 0 : index
    %3 = vector.load %arg3[%c0_3, %c0_4] : memref<1x128xf32, #tpu.memory_space<vmem>>, vector<1x128xf32>
    %4 = vector.broadcast %3 : vector<1x128xf32> to vector<8x128xf32>
    %5 = arith.addf %2, %4 : vector<8x128xf32>
    %cst_5 = arith.constant 0.000000e+00 : f32
    %6 = vector.broadcast %cst_5 : f32 to vector<8x128xf32>
    %7 = arith.maximumf %5, %6 : vector<8x128xf32>
    %8 = arith.truncf %7 : vector<8x128xf32> to vector<8x128xbf16>
    %c0_6 = arith.constant 0 : index
    %c0_7 = arith.constant 0 : index
    %9 = vector.load %arg4[%c0_6, %c0_7] : memref<128x128xbf16, #tpu.memory_space<vmem>>, vector<128x128xbf16>
    %cst_8 = arith.constant dense<0.000000e+00> : vector<8x128xf32>
    %10 = tpu.matmul %8, %9, %cst_8 {dimension_numbers = #tpu.dot_dimension_numbers<[1], [0], [0], [1], [0, 0, 1, 1], [], []>} : vector<8x128xbf16>, vector<128x128xbf16>, vector<8x128xf32> -> vector<8x128xf32>
    %c0_9 = arith.constant 0 : index
    %c0_10 = arith.constant 0 : index
    %11 = vector.load %arg5[%c0_9, %c0_10] : memref<1x128xf32, #tpu.memory_space<vmem>>, vector<1x128xf32>
    %12 = vector.broadcast %11 : vector<1x128xf32> to vector<8x128xf32>
    %13 = arith.addf %10, %12 : vector<8x128xf32>
    %14 = arith.negf %13 : vector<8x128xf32>
    %15 = math.exp %14 : vector<8x128xf32>
    %cst_11 = arith.constant 1.000000e+00 : f32
    %16 = vector.broadcast %cst_11 : f32 to vector<8x128xf32>
    %17 = arith.addf %16, %15 : vector<8x128xf32>
    %18 = arith.divf %16, %17 : vector<8x128xf32>
    %c0_12 = arith.constant 0 : index
    %c0_13 = arith.constant 0 : index
    %19 = vector.load %arg6[%c0_12, %c0_13] : memref<8x128xf32, #tpu.memory_space<vmem>>, vector<8x128xf32>
    tpu.vector_store %arg6[%c0_12, %c0_13], %18 {strides = array<i32>} : memref<8x128xf32, #tpu.memory_space<vmem>>, vector<8x128xf32>,
    return
  }
  func.func @transform_0(%arg0: i32) -> (i32, i32) {
    %c0_i32 = arith.constant 0 : i32
    %c0_i32_0 = arith.constant 0 : i32
    return %arg0, %c0_i32 : i32, i32
  }
  func.func @transform_1(%arg0: i32) -> (i32, i32) {
    %c0_i32 = arith.constant 0 : i32
    %c0_i32_0 = arith.constant 0 : i32
    %c0_i32_1 = arith.constant 0 : i32
    return %c0_i32, %c0_i32_0 : i32, i32
  }
  func.func @transform_2(%arg0: i32) -> (i32, i32) {
    %c0_i32 = arith.constant 0 : i32
    %c0_i32_0 = arith.constant 0 : i32
    %c0_i32_1 = arith.constant 0 : i32
    return %c0_i32, %c0_i32_0 : i32, i32
  }
  func.func @transform_3(%arg0: i32) -> (i32, i32) {
    %c0_i32 = arith.constant 0 : i32
    %c0_i32_0 = arith.constant 0 : i32
    %c0_i32_1 = arith.constant 0 : i32
    return %c0_i32, %c0_i32_0 : i32, i32
  }
  func.func @transform_4(%arg0: i32) -> (i32, i32) {
    %c0_i32 = arith.constant 0 : i32
    %c0_i32_0 = arith.constant 0 : i32
    %c0_i32_1 = arith.constant 0 : i32
    return %c0_i32, %c0_i32_0 : i32, i32
  }
  func.func @transform_5(%arg0: i32) -> (i32, i32) {
    %c0_i32 = arith.constant 0 : i32
    %c0_i32_0 = arith.constant 0 : i32
    return %arg0, %c0_i32 : i32, i32
  }
}

</mosaic_0001>

<bundles_post_ra>
// kernel: tpu_custom_call.1
= control target key start
LH: loop header
LB: loop body
LE: loop exit
PB: predicated region body
PF: predicated region fallthrough
CT: control target
= control target key end

     0   :  { %10 = vsyncpa [#allocation3], 0  ;;  %s556_s0 = inlined_call_operand.hbm [shape: bf16[8,128], index: 0, kind: input, shape index: {}]   ;;  %s557_s1 = inlined_call_operand.hbm [shape: bf16[128,128], index: 1, kind: input, shape index: {}]   ;;  %s558_s2 = inlined_call_operand.vmem [shape: f32[1,128], index: 2, kind: input, shape index: {}]   ;;  %s559_s3 = inlined_call_operand.hbm [shape: bf16[128,128], index: 3, kind: input, shape index: {}]   ;;  %s560_s4 = inlined_call_operand.vmem [shape: f32[1,128], index: 4, kind: input, shape index: {}]   ;;  %s561_s5 = inlined_call_operand.hbm [shape: f32[8,128], index: 5, kind: output, shape index: {}]  }
   0x1   :  { %11 = vsyncpa [#allocation6], 0 }
   0x2   :  { %12 = vsyncpa [#allocation4], 0  ;;  %s500_s18 = smov [#allocation5]  }
   0x3   :  { %s28_s19 = sshll.u32 %s500_s18, 4  ;;  %s29_s19 = int_to_ptr.vmem [resolvable:$true] %s28_s19 }
   0x4   :  { %s422_s20 = scalar_lea.vmem %s29_s19, 1024  ;;  %p427_p1 = scmp.lt.s32.totalorder %s29_s19, %s29_s19 }
   0x5   :  { %p423_p0 = scmp.ne.s32.totalorder %s29_s19, %s422_s20  ;;  %p428_p2 = scmp.lt.s32.totalorder %s422_s20, %s422_s20 }
   0x7   :  { %p429_p3 = por %p428_p2, %p427_p1 }
   0x9   :  { %p430_p4 = pnand %p429_p3, %p423_p0 }
   0xb   :  { %433 = shalt.err (!%p430_p4)
}
   0xc   :  { %s501_s21 = smov 64   ;;  %s502_s22 = smov 4  }
   0xd   :  { %34 = dma.hbm_to_vmem [thread:$0]  %s557_s1, 1024, %s29_s19, [#allocation6], %s501_s21, %s501_s21, %s502_s22  }
   0xe   :  { %s503_s25 = smov [#allocation2]   ;;  %s504_s27 = smov [#allocation7]  }
   0xf   :  { %s19_s26 = sshll.u32 %s503_s25, 4  ;;  %s42_s28 = sshll.u32 %s504_s27, 4  ;;  %s20_s26 = int_to_ptr.vmem [resolvable:$true] %s19_s26  ;;  %s43_s28 = int_to_ptr.vmem [resolvable:$true] %s42_s28 }
  0x10   :  { %s442_s29 = scalar_lea.vmem %s20_s26, 64  ;;  %p447_p6 = scmp.lt.s32.totalorder %s20_s26, %s20_s26 }
  0x11   :  { %p443_p5 = scmp.ne.s32.totalorder %s20_s26, %s442_s29  ;;  %p448_p7 = scmp.lt.s32.totalorder %s442_s29, %s442_s29 }
  0x13   :  { %p449_p8 = por %p448_p7, %p447_p6 }
  0x15   :  { %p450_p9 = pnand %p449_p8, %p443_p5 }
  0x17   :  { %453 = shalt.err (!%p450_p9)
}
  0x18   :  { %22 = dma.hbm_to_vmem [thread:$0]  %s556_s0, 64, %s20_s26, [#allocation3]  }
  0x19   :  { %s462_s7 = scalar_lea.vmem %s43_s28, 1024  ;;  %p467_p11 = scmp.lt.s32.totalorder %s43_s28, %s43_s28 }
  0x1a   :  { %p463_p10 = scmp.ne.s32.totalorder %s43_s28, %s462_s7  ;;  %p468_p12 = scmp.lt.s32.totalorder %s462_s7, %s462_s7 }
  0x1c   :  { %p469_p13 = por %p468_p12, %p467_p11 }
  0x1e   :  { %p470_p0 = pnand %p469_p13, %p463_p10 }
  0x20   :  { %473 = shalt.err (!%p470_p0)
}
  0x21   :  { %48 = dma.hbm_to_vmem [thread:$0]  %s559_s3, 1024, %s43_s28, [#allocation6], %s501_s21, %s501_s21, %s502_s22  }
  0x22   :  { %494 = dma.done.wait [#allocation3], 64  }
  0x23   :  { %495 = vsyncadd [#allocation3], 4294967232 }
  0x24   :  { %496 = dma.done.wait [#allocation6], 2048  }
  0x25   :  { %497 = vsyncadd [#allocation6], 4294965248  ;;  %v505_v0 = vmov 0.0   ;;  %vm506_vm0 = vmmov 0   ;;  %v394_v1 = vld [vmem:[#allocation5 + $0x38] sm:$0xff]   ;;  %v395_v2 = vld [vmem:[#allocation5 + $0x30] sm:$0xff]  }
  0x26   :  { %346 = vmatprep.subr.bf16.mxu0 %v505_v0  ;;  %362 = vmatprep.mubr.msk.bf16.mxu0 %vm506_vm0, %v505_v0  ;;  %v396_v3 = vld [vmem:[#allocation5 + $0x28] sm:$0xff]   ;;  %v402_v4 = vld [vmem:[#allocation7 + $0x38] sm:$0xff]   ;;  %v397_v5 = vld [vmem:[#allocation5 + $0x20] sm:$0xff]  }
  0x27   :  { %366 = vmatprep.subr.bf16.mxu1 %v505_v0  ;;  %382 = vmatprep.mubr.msk.bf16.mxu1 %vm506_vm0, %v505_v0  ;;  %v403_v6 = vld [vmem:[#allocation7 + $0x30] sm:$0xff]   ;;  %v398_v7 = vld [vmem:[#allocation5 + $0x18] sm:$0xff]   ;;  %v404_v8 = vld [vmem:[#allocation7 + $0x28] sm:$0xff]  }
  0x28   :  { %347 = vmatpush3.bf16.msra.mxu0 %v394_v1  ;;  %367 = vmatpush3.bf16.msra.mxu1 %v402_v4  ;;  %v399_v9 = vld [vmem:[#allocation5 + $0x10] sm:$0xff]   ;;  %v405_v10 = vld [vmem:[#allocation7 + $0x20] sm:$0xff]   ;;  %v400_v11 = vld [vmem:[#allocation5 + $0x8] sm:$0xff]  }
  0x29   :  { %348 = vmatprep.subr.bf16.mxu0 %v505_v0  ;;  %368 = vmatprep.subr.bf16.mxu1 %v505_v0  ;;  %v406_v12 = vld [vmem:[#allocation7 + $0x18] sm:$0xff]   ;;  %v401_v13 = vld [vmem:[#allocation5] sm:$0xff]   ;;  %v407_v14 = vld [vmem:[#allocation7 + $0x10] sm:$0xff]  }
  0x2a   :  { %v61_v15 = vld [vmem:[#allocation2] sm:$0xf]  ;;  %v408_v16 = vld [vmem:[#allocation7 + $0x8] sm:$0xff]   ;;  %v409_v17 = vld [vmem:[#allocation7] sm:$0xff]  }
  0x2b   :  { %v309_v18 = vld [vmem:[%s558_s2] ss:$0 sm:$0xff]  ;;  %s507_s2 = smov [#allocation8]  }
  0x2c   :  { %349 = vmatpush3.bf16.msra.mxu0 %v395_v2  ;;  %369 = vmatpush3.bf16.msra.mxu1 %v403_v6  ;;  %v318_v26 = vld [vmem:[%s560_s4] ss:$0 sm:$0xff]  ;;  %s299_s11 = sshll.u32 %s507_s2, 4  ;;  %s300_s11 = int_to_ptr.vmem [resolvable:$true] %s299_s11 }
  0x2d   :  { %350 = vmatprep.subr.bf16.mxu0 %v505_v0  ;;  %370 = vmatprep.subr.bf16.mxu1 %v505_v0  ;;  %s474_s12 = scalar_lea.vmem %s300_s11, 128  ;;  %p479_p2 = scmp.lt.s32.totalorder %s300_s11, %s300_s11 }
  0x2e   :  { %p475_p1 = scmp.ne.s32.totalorder %s300_s11, %s474_s12  ;;  %p480_p3 = scmp.lt.s32.totalorder %s474_s12, %s474_s12 }
  0x30   :  { %351 = vmatpush3.bf16.msra.mxu0 %v396_v3  ;;  %371 = vmatpush3.bf16.msra.mxu1 %v404_v8  ;;  %p481_p4 = por %p480_p3, %p479_p2 }
  0x31   :  { %352 = vmatprep.subr.bf16.mxu0 %v505_v0  ;;  %372 = vmatprep.subr.bf16.mxu1 %v505_v0 }
  0x32   :  { %p482_p5 = pnand %p481_p4, %p475_p1 }
  0x34   :  { %353 = vmatpush3.bf16.msra.mxu0 %v397_v5  ;;  %373 = vmatpush3.bf16.msra.mxu1 %v405_v10 }
  0x35   :  { %354 = vmatprep.subr.bf16.mxu0 %v505_v0  ;;  %374 = vmatprep.subr.bf16.mxu1 %v505_v0 }
  0x38   :  { %355 = vmatpush3.bf16.msra.mxu0 %v398_v7  ;;  %375 = vmatpush3.bf16.msra.mxu1 %v406_v12 }
  0x39   :  { %356 = vmatprep.subr.bf16.mxu0 %v505_v0  ;;  %376 = vmatprep.subr.bf16.mxu1 %v505_v0 }
  0x3c   :  { %357 = vmatpush3.bf16.msra.mxu0 %v399_v9  ;;  %377 = vmatpush3.bf16.msra.mxu1 %v407_v14 }
  0x3d   :  { %358 = vmatprep.subr.bf16.mxu0 %v505_v0  ;;  %378 = vmatprep.subr.bf16.mxu1 %v505_v0 }
  0x40   :  { %359 = vmatpush3.bf16.msra.mxu0 %v400_v11  ;;  %379 = vmatpush3.bf16.msra.mxu1 %v408_v16 }
  0x41   :  { %360 = vmatprep.subr.bf16.mxu0 %v505_v0  ;;  %380 = vmatprep.subr.bf16.mxu1 %v505_v0 }
  0x44   :  { %361 = vmatpush3.bf16.msra.mxu0 %v401_v13  ;;  %381 = vmatpush3.bf16.msra.mxu1 %v409_v17 }
  0x47   :  { %363 = vmatmul.mubr.bf16.vlgmr.msra.gmra.mxu0 %v61_v15 }
 0x107   :  { %v167_v19 = vpop.f32.mrf.mxu0 }
 0x108   :  { %v168_v20 = vadd.f32 %v309_v18, %v167_v19 }
 0x109   :  { %v364_v21 = vpop.f32.mrf.mxu0 }
 0x10a   :  { %v173_v22 = vmax.f32 %v168_v20, 0.0 }
 0x10b   :  { %v170_v23 = vpop.f32.mrf.mxu0 }
 0x10c   :  { %v174_v24 = vpack.c.bf16 %v173_v22, %v173_v22 }
 0x10d   :  { %v365_v25 = vpop.f32.mrf.mxu0 }
 0x10e   :  { %383 = vmatmul.mubr.bf16.vlgmr.msra.gmra.mxu1 %v174_v24 }
 0x1ce   :  { %v280_v27 = vpop.f32.mrf.mxu1 }
 0x1cf   :  { %v281_v28 = vadd.f32 %v318_v26, %v280_v27 }
 0x1d0   :  { %v384_v29 = vpop.f32.mrf.mxu1 }
 0x1d1   :  { %v327_v30 = vmul.f32 -1.442695, %v281_v28 }
 0x1d2   :  { %v283_v31 = vpop.f32.mrf.mxu1 }
 0x1d3   :  { %410 = vpow2.f32 %v327_v30 }
 0x1d4   :  { %v385_v32 = vpop.f32.mrf.mxu1 }
 0x1e0   :  { %v411_v33 = vpop.eup %410 }
 0x1e1   :  { %v289_v34 = vadd.f32 1.0, %v411_v33 }
 0x1e3   :  { %412 = vrcp.f32 %v289_v34 }
 0x1f0   :  { %v413_v35 = vpop.eup %412 }
 0x1f1   :  { %292 = vst [vmem:[#allocation8] sm:$0xff] %v413_v35 }
 0x1f2   :  { %485 = shalt.err (!%p482_p5)
}
 0x1f3   :  { %302 = dma.vmem_to_hbm [thread:$0]  %s300_s11, 128, %s561_s5, [#allocation4]  }
 0x1f4   :  { %498 = dma.done.wait [#allocation4], 128  }
 0x1f5   :  { %499 = vsyncadd [#allocation4], 4294967168 }
 0x1f6   :  { %306 = vsyncpa [#allocation3], 1 }
 0x1f7   :  { %307 = vsyncpa [#allocation6], 1 }
 0x1f8   :  { %308 = vsyncpa [#allocation4], 1 }

// kernel: tpu_custom_call.1
= control target key start
LH: loop header
LB: loop body
LE: loop exit
PB: predicated region body
PF: predicated region fallthrough
CT: control target
= control target key end

     0   :  { %10 = vsyncpa [#allocation3], 0  ;;  %s556_s0 = inlined_call_operand.hbm [shape: bf16[8,128], index: 0, kind: input, shape index: {}]   ;;  %s557_s1 = inlined_call_operand.hbm [shape: bf16[128,128], index: 1, kind: input, shape index: {}]   ;;  %s558_s2 = inlined_call_operand.vmem [shape: f32[1,128], index: 2, kind: input, shape index: {}]   ;;  %s559_s3 = inlined_call_operand.hbm [shape: bf16[128,128], index: 3, kind: input, shape index: {}]   ;;  %s560_s4 = inlined_call_operand.vmem [shape: f32[1,128], index: 4, kind: input, shape index: {}]   ;;  %s561_s5 = inlined_call_operand.hbm [shape: f32[8,128], index: 5, kind: output, shape index: {}]  }
   0x1   :  { %11 = vsyncpa [#allocation6], 0 }
   0x2   :  { %12 = vsyncpa [#allocation4], 0  ;;  %s500_s18 = smov [#allocation5]  }
   0x3   :  { %s28_s19 = sshll.u32 %s500_s18, 4  ;;  %s29_s19 = int_to_ptr.vmem [resolvable:$true] %s28_s19 }
   0x4   :  { %s422_s20 = scalar_lea.vmem %s29_s19, 1024  ;;  %p427_p1 = scmp.lt.s32.totalorder %s29_s19, %s29_s19 }
   0x5   :  { %p423_p0 = scmp.ne.s32.totalorder %s29_s19, %s422_s20  ;;  %p428_p2 = scmp.lt.s32.totalorder %s422_s20, %s422_s20 }
   0x7   :  { %p429_p3 = por %p428_p2, %p427_p1 }
   0x9   :  { %p430_p4 = pnand %p429_p3, %p423_p0 }
   0xb   :  { %433 = shalt.err (!%p430_p4)
}
   0xc   :  { %s501_s21 = smov 64   ;;  %s502_s22 = smov 4  }
   0xd   :  { %34 = dma.hbm_to_vmem [thread:$0]  %s557_s1, 1024, %s29_s19, [#allocation6], %s501_s21, %s501_s21, %s502_s22  }
   0xe   :  { %s503_s25 = smov [#allocation2]   ;;  %s504_s27 = smov [#allocation7]  }
   0xf   :  { %s19_s26 = sshll.u32 %s503_s25, 4  ;;  %s42_s28 = sshll.u32 %s504_s27, 4  ;;  %s20_s26 = int_to_ptr.vmem [resolvable:$true] %s19_s26  ;;  %s43_s28 = int_to_ptr.vmem [resolvable:$true] %s42_s28 }
  0x10   :  { %s442_s29 = scalar_lea.vmem %s20_s26, 64  ;;  %p447_p6 = scmp.lt.s32.totalorder %s20_s26, %s20_s26 }
  0x11   :  { %p443_p5 = scmp.ne.s32.totalorder %s20_s26, %s442_s29  ;;  %p448_p7 = scmp.lt.s32.totalorder %s442_s29, %s442_s29 }
  0x13   :  { %p449_p8 = por %p448_p7, %p447_p6 }
  0x15   :  { %p450_p9 = pnand %p449_p8, %p443_p5 }
  0x17   :  { %453 = shalt.err (!%p450_p9)
}
  0x18   :  { %22 = dma.hbm_to_vmem [thread:$0]  %s556_s0, 64, %s20_s26, [#allocation3]  }
  0x19   :  { %s462_s7 = scalar_lea.vmem %s43_s28, 1024  ;;  %p467_p11 = scmp.lt.s32.totalorder %s43_s28, %s43_s28 }
  0x1a   :  { %p463_p10 = scmp.ne.s32.totalorder %s43_s28, %s462_s7  ;;  %p468_p12 = scmp.lt.s32.totalorder %s462_s7, %s462_s7 }
  0x1c   :  { %p469_p13 = por %p468_p12, %p467_p11 }
  0x1e   :  { %p470_p0 = pnand %p469_p13, %p463_p10 }
  0x20   :  { %473 = shalt.err (!%p470_p0)
}
  0x21   :  { %48 = dma.hbm_to_vmem [thread:$0]  %s559_s3, 1024, %s43_s28, [#allocation6], %s501_s21, %s501_s21, %s502_s22  }
  0x22   :  { %494 = dma.done.wait [#allocation3], 64  }
  0x23   :  { %495 = vsyncadd [#allocation3], 4294967232 }
  0x24   :  { %496 = dma.done.wait [#allocation6], 2048  }
  0x25   :  { %497 = vsyncadd [#allocation6], 4294965248  ;;  %v505_v0 = vmov 0.0   ;;  %vm506_vm0 = vmmov 0   ;;  %v394_v1 = vld [vmem:[#allocation5 + $0x38] sm:$0xff]   ;;  %v395_v2 = vld [vmem:[#allocation5 + $0x30] sm:$0xff]  }
  0x26   :  { %346 = vmatprep.subr.bf16.mxu0 %v505_v0  ;;  %362 = vmatprep.mubr.msk.bf16.mxu0 %vm506_vm0, %v505_v0  ;;  %v396_v3 = vld [vmem:[#allocation5 + $0x28] sm:$0xff]   ;;  %v402_v4 = vld [vmem:[#allocation7 + $0x38] sm:$0xff]   ;;  %v397_v5 = vld [vmem:[#allocation5 + $0x20] sm:$0xff]  }
  0x27   :  { %366 = vmatprep.subr.bf16.mxu1 %v505_v0  ;;  %382 = vmatprep.mubr.msk.bf16.mxu1 %vm506_vm0, %v505_v0  ;;  %v403_v6 = vld [vmem:[#allocation7 + $0x30] sm:$0xff]   ;;  %v398_v7 = vld [vmem:[#allocation5 + $0x18] sm:$0xff]   ;;  %v404_v8 = vld [vmem:[#allocation7 + $0x28] sm:$0xff]  }
  0x28   :  { %347 = vmatpush3.bf16.msra.mxu0 %v394_v1  ;;  %367 = vmatpush3.bf16.msra.mxu1 %v402_v4  ;;  %v399_v9 = vld [vmem:[#allocation5 + $0x10] sm:$0xff]   ;;  %v405_v10 = vld [vmem:[#allocation7 + $0x20] sm:$0xff]   ;;  %v400_v11 = vld [vmem:[#allocation5 + $0x8] sm:$0xff]  }
  0x29   :  { %348 = vmatprep.subr.bf16.mxu0 %v505_v0  ;;  %368 = vmatprep.subr.bf16.mxu1 %v505_v0  ;;  %v406_v12 = vld [vmem:[#allocation7 + $0x18] sm:$0xff]   ;;  %v401_v13 = vld [vmem:[#allocation5] sm:$0xff]   ;;  %v407_v14 = vld [vmem:[#allocation7 + $0x10] sm:$0xff]  }
  0x2a   :  { %v61_v15 = vld [vmem:[#allocation2] sm:$0xf]  ;;  %v408_v16 = vld [vmem:[#allocation7 + $0x8] sm:$0xff]   ;;  %v409_v17 = vld [vmem:[#allocation7] sm:$0xff]  }
  0x2b   :  { %v309_v18 = vld [vmem:[%s558_s2] ss:$0 sm:$0xff]  ;;  %s507_s2 = smov [#allocation8]  }
  0x2c   :  { %349 = vmatpush3.bf16.msra.mxu0 %v395_v2  ;;  %369 = vmatpush3.bf16.msra.mxu1 %v403_v6  ;;  %v318_v26 = vld [vmem:[%s560_s4] ss:$0 sm:$0xff]  ;;  %s299_s11 = sshll.u32 %s507_s2, 4  ;;  %s300_s11 = int_to_ptr.vmem [resolvable:$true] %s299_s11 }
  0x2d   :  { %350 = vmatprep.subr.bf16.mxu0 %v505_v0  ;;  %370 = vmatprep.subr.bf16.mxu1 %v505_v0  ;;  %s474_s12 = scalar_lea.vmem %s300_s11, 128  ;;  %p479_p2 = scmp.lt.s32.totalorder %s300_s11, %s300_s11 }
  0x2e   :  { %p475_p1 = scmp.ne.s32.totalorder %s300_s11, %s474_s12  ;;  %p480_p3 = scmp.lt.s32.totalorder %s474_s12, %s474_s12 }
  0x30   :  { %351 = vmatpush3.bf16.msra.mxu0 %v396_v3  ;;  %371 = vmatpush3.bf16.msra.mxu1 %v404_v8  ;;  %p481_p4 = por %p480_p3, %p479_p2 }
  0x31   :  { %352 = vmatprep.subr.bf16.mxu0 %v505_v0  ;;  %372 = vmatprep.subr.bf16.mxu1 %v505_v0 }
  0x32   :  { %p482_p5 = pnand %p481_p4, %p475_p1 }
  0x34   :  { %353 = vmatpush3.bf16.msra.mxu0 %v397_v5  ;;  %373 = vmatpush3.bf16.msra.mxu1 %v405_v10 }
  0x35   :  { %354 = vmatprep.subr.bf16.mxu0 %v505_v0  ;;  %374 = vmatprep.subr.bf16.mxu1 %v505_v0 }
  0x38   :  { %355 = vmatpush3.bf16.msra.mxu0 %v398_v7  ;;  %375 = vmatpush3.bf16.msra.mxu1 %v406_v12 }
  0x39   :  { %356 = vmatprep.subr.bf16.mxu0 %v505_v0  ;;  %376 = vmatprep.subr.bf16.mxu1 %v505_v0 }
  0x3c   :  { %357 = vmatpush3.bf16.msra.mxu0 %v399_v9  ;;  %377 = vmatpush3.bf16.msra.mxu1 %v407_v14 }
  0x3d   :  { %358 = vmatprep.subr.bf16.mxu0 %v505_v0  ;;  %378 = vmatprep.subr.bf16.mxu1 %v505_v0 }
  0x40   :  { %359 = vmatpush3.bf16.msra.mxu0 %v400_v11  ;;  %379 = vmatpush3.bf16.msra.mxu1 %v408_v16 }
  0x41   :  { %360 = vmatprep.subr.bf16.mxu0 %v505_v0  ;;  %380 = vmatprep.subr.bf16.mxu1 %v505_v0 }
  0x44   :  { %361 = vmatpush3.bf16.msra.mxu0 %v401_v13  ;;  %381 = vmatpush3.bf16.msra.mxu1 %v409_v17 }
  0x47   :  { %363 = vmatmul.mubr.bf16.vlgmr.msra.gmra.mxu0 %v61_v15 }
 0x107   :  { %v167_v19 = vpop.f32.mrf.mxu0 }
 0x108   :  { %v168_v20 = vadd.f32 %v309_v18, %v167_v19 }
 0x109   :  { %v364_v21 = vpop.f32.mrf.mxu0 }
 0x10a   :  { %v173_v22 = vmax.f32 %v168_v20, 0.0 }
 0x10b   :  { %v170_v23 = vpop.f32.mrf.mxu0 }
 0x10c   :  { %v174_v24 = vpack.c.bf16 %v173_v22, %v173_v22 }
 0x10d   :  { %v365_v25 = vpop.f32.mrf.mxu0 }
 0x10e   :  { %383 = vmatmul.mubr.bf16.vlgmr.msra.gmra.mxu1 %v174_v24 }
 0x1ce   :  { %v280_v27 = vpop.f32.mrf.mxu1 }
 0x1cf   :  { %v281_v28 = vadd.f32 %v318_v26, %v280_v27 }
 0x1d0   :  { %v384_v29 = vpop.f32.mrf.mxu1 }
 0x1d1   :  { %v327_v30 = vmul.f32 -1.442695, %v281_v28 }
 0x1d2   :  { %v283_v31 = vpop.f32.mrf.mxu1 }
 0x1d3   :  { %410 = vpow2.f32 %v327_v30 }
 0x1d4   :  { %v385_v32 = vpop.f32.mrf.mxu1 }
 0x1e0   :  { %v411_v33 = vpop.eup %410 }
 0x1e1   :  { %v289_v34 = vadd.f32 1.0, %v411_v33 }
 0x1e3   :  { %412 = vrcp.f32 %v289_v34 }
 0x1f0   :  { %v413_v35 = vpop.eup %412 }
 0x1f1   :  { %292 = vst [vmem:[#allocation8] sm:$0xff] %v413_v35 }
 0x1f2   :  { %485 = shalt.err (!%p482_p5)
}
 0x1f3   :  { %302 = dma.vmem_to_hbm [thread:$0]  %s300_s11, 128, %s561_s5, [#allocation4]  }
 0x1f4   :  { %498 = dma.done.wait [#allocation4], 128  }
 0x1f5   :  { %499 = vsyncadd [#allocation4], 4294967168 }
 0x1f6   :  { %306 = vsyncpa [#allocation3], 1 }
 0x1f7   :  { %307 = vsyncpa [#allocation6], 1 }
 0x1f8   :  { %308 = vsyncpa [#allocation4], 1 }

</bundles_post_ra>
